<compile_context>
chip_gen: v6e
topology: v6e:2x2x1
jax: 0.10.0
libtpu: 0.0.40
codegen_flags: <defaults>
</compile_context>

<pallas_src>
import functools

import jax
import jax.numpy as jnp
from jax import lax
from jax.experimental import pallas as pl
from jax.experimental.pallas import tpu as pltpu


def _round_up(n, m):
    return ((n + m - 1) // m) * m


def rnn_kernel(pre_ref, w_hh_ref, w_fc_ref, b_fc_ref, out_ref):
    # pre_ref : (T, B_pad, H_pad) f32  time-major pre-activations
    #           = emb(x) @ W_ih^T + b_ih + b_hh   (gather done in JAX glue)
    # w_hh_ref: (H_pad, H_pad) f32  W_hh^T, zero-padded
    # w_fc_ref: (H_pad, O_pad) f32  W_fc^T, zero-padded
    # b_fc_ref: (1, O_pad)     f32  fc bias, zero-padded
    # out_ref : (B_pad, O_pad) f32  = fc(h_T)
    T = pre_ref.shape[0]

    # Loop-invariant MXU RHS: load once so the weight push hoists out of the
    # unrolled recurrence instead of being re-pushed every serial step.
    w_hh = w_hh_ref[...]
    h0 = jnp.zeros((pre_ref.shape[1], pre_ref.shape[2]), jnp.float32)

    def body(t, h):
        # TODO(synk): bf16 operands here (keep f32 accumulate/tanh) for v6e/v7x speed.
        return jnp.tanh(
            pre_ref[t] + jnp.dot(h, w_hh, preferred_element_type=jnp.float32))

    h_T = lax.fori_loop(0, T, body, h0, unroll=True)

    # Fused final Linear: zero-padded to O_pad=128 lanes -> normal MXU matmul and
    # an unmasked lane-dense store.
    out_ref[...] = (
        jnp.dot(h_T, w_fc_ref[...], preferred_element_type=jnp.float32)
        + b_fc_ref[...])


def prepare_rnn_params(emb_table, w_ih, w_hh, b_ih, b_hh, w_fc, b_fc):
    """Weight-only preprocessing; call once at parameter-build time, not per forward."""
    H = w_hh.shape[0]
    O = w_fc.shape[1]
    H_pad = _round_up(H, 128)   # lane
    O_pad = _round_up(O, 128)   # lane
    hp = jax.lax.Precision.HIGHEST

    # Fold embedding projection + both RNN biases into one table; pad hidden lanes
    # with zeros so padded lanes stay exactly 0 through tanh(0)=0.
    proj_table = jnp.dot(emb_table, w_ih, precision=hp) + (b_ih + b_hh)   # (V, H)
    proj_table = jnp.pad(proj_table, ((0, 0), (0, H_pad - H)))            # (V, H_pad)

    w_hh_pad = jnp.pad(w_hh, ((0, H_pad - H), (0, H_pad - H)))            # (H_pad, H_pad)
    w_fc_pad = jnp.pad(w_fc, ((0, H_pad - H), (0, O_pad - O)))            # (H_pad, O_pad)
    b_fc_pad = jnp.pad(b_fc, (0, O_pad - O)).reshape(1, O_pad)            # (1, O_pad)

    return dict(proj_table=proj_table, w_hh_pad=w_hh_pad,
                w_fc_pad=w_fc_pad, b_fc_pad=b_fc_pad, out_size=O)


@functools.partial(jax.jit, static_argnames=("out_size",))
def _rnn_forward(x, proj_table, w_hh_pad, w_fc_pad, b_fc_pad, *, out_size):
    B, T = x.shape
    B_pad = _round_up(B, 8)          # sublane
    O_pad = w_fc_pad.shape[1]

    # Pad batch with token 0 (padding_idx); padded rows are garbage but sliced off.
    x_pad = jnp.pad(x, ((0, B_pad - B), (0, 0)))                          # (B_pad, T)
    # Gather directly in time-major order -> (T, B_pad, H_pad); no activation transpose.
    pre_ih = proj_table[x_pad.T]

    out = pl.pallas_call(
        rnn_kernel,
        out_shape=jax.ShapeDtypeStruct((B_pad, O_pad), jnp.float32),
        in_specs=[
            pl.BlockSpec(memory_space=pltpu.MemorySpace.VMEM),   # pre_ih
            pl.BlockSpec(memory_space=pltpu.MemorySpace.VMEM),   # w_hh_pad
            pl.BlockSpec(memory_space=pltpu.MemorySpace.VMEM),   # w_fc_pad
            pl.BlockSpec(memory_space=pltpu.MemorySpace.VMEM),   # b_fc_pad
        ],
        out_specs=pl.BlockSpec(memory_space=pltpu.MemorySpace.VMEM),
    )(pre_ih, w_hh_pad, w_fc_pad, b_fc_pad)

    return out[:B, :out_size]


def rnn_forward(x, prepared):
    """x: [B, T] int32 token ids. Returns [B, output_size] float32."""
    return _rnn_forward(x, prepared["proj_table"], prepared["w_hh_pad"],
                        prepared["w_fc_pad"], prepared["b_fc_pad"],
                        out_size=prepared["out_size"])


def make_params(key, vocab_size, emb_size, hidden_size, output_size, padding_idx=0):
    ks = jax.random.split(key, 7)
    # Embedding ~ N(0,1), padding_idx row zeroed (PyTorch semantics).
    emb_table = jax.random.normal(ks[0], (vocab_size, emb_size), jnp.float32)
    emb_table = emb_table.at[padding_idx].set(0.0)
    # nn.RNN init: U(-1/sqrt(H), 1/sqrt(H)); stored transposed for x @ W^T.
    bound = 1.0 / jnp.sqrt(jnp.float32(hidden_size))
    w_ih = jax.random.uniform(ks[1], (emb_size, hidden_size), jnp.float32, -bound, bound)
    w_hh = jax.random.uniform(ks[2], (hidden_size, hidden_size), jnp.float32, -bound, bound)
    b_ih = jax.random.uniform(ks[3], (hidden_size,), jnp.float32, -bound, bound)
    b_hh = jax.random.uniform(ks[4], (hidden_size,), jnp.float32, -bound, bound)
    # nn.Linear init (same bound form), stored transposed.
    w_fc = jax.random.uniform(ks[5], (hidden_size, output_size), jnp.float32, -bound, bound)
    b_fc = jax.random.uniform(ks[6], (output_size,), jnp.float32, -bound, bound)
    return emb_table, w_ih, w_hh, b_ih, b_hh, w_fc, b_fc


if __name__ == "__main__":
    vocab_size, emb_size, hidden_size, output_size = 30, 300, 50, 1
    B, T = 2, 8

    key = jax.random.PRNGKey(0)
    pkey, xkey = jax.random.split(key)
    params = make_params(pkey, vocab_size, emb_size, hidden_size, output_size)
    prepared = prepare_rnn_params(*params)                 # offline weight folding/padding

    x = jax.random.randint(xkey, (B, T), 0, vocab_size, dtype=jnp.int32)
    x = x.at[:, -2:].set(0)  # a couple of padding tokens

    out = rnn_forward(x, prepared)
    out = jax.block_until_ready(out)

    # Pure-JAX reference of the same semantics (torch.nn.Embedding/RNN/Linear, f32).
    emb_table, w_ih, w_hh, b_ih, b_hh, w_fc, b_fc = params
    hp = jax.lax.Precision.HIGHEST
    emb = emb_table[x]
    h = jnp.zeros((B, hidden_size), jnp.float32)
    for t in range(T):
        h = jnp.tanh(jnp.dot(emb[:, t, :], w_ih, precision=hp) + b_ih
                     + jnp.dot(h, w_hh, precision=hp) + b_hh)
    ref = jnp.dot(h, w_fc, precision=hp) + b_fc

    assert out.shape == (B, output_size)
    assert jnp.allclose(out, ref, atol=1e-4, rtol=1e-4), (out, ref)

    print("KERNEL_OK")
</pallas_src>

<mosaic_0001>
module attributes {stable_mosaic.version = 11 : i64} {
  func.func @rnn_kernel(%arg0: memref<8x8x128xf32, #tpu.memory_space<vmem>>, %arg1: memref<128x128xf32, #tpu.memory_space<vmem>>, %arg2: memref<128x128xf32, #tpu.memory_space<vmem>>, %arg3: memref<1x128xf32, #tpu.memory_space<vmem>>, %arg4: memref<8x128xf32, #tpu.memory_space<vmem>>) attributes {dimension_semantics = [], scalar_prefetch = 0 : i64, scratch_operands = 0 : i64, tpu.core_type = #tpu.core_type<tc>} {
    %c0 = arith.constant 0 : index
    %c0_0 = arith.constant 0 : index
    %0 = vector.load %arg1[%c0, %c0_0] : memref<128x128xf32, #tpu.memory_space<vmem>>, vector<128x128xf32>
    %cst = arith.constant 0.000000e+00 : f32
    %1 = vector.broadcast %cst : f32 to vector<8x128xf32>
    %c0_i32 = arith.constant 0 : i32
    %2 = arith.index_cast %c0_i32 : i32 to index
    %c0_1 = arith.constant 0 : index
    %c0_2 = arith.constant 0 : index
    %3 = vector.load %arg0[%2, %c0_1, %c0_2] : memref<8x8x128xf32, #tpu.memory_space<vmem>>, vector<1x8x128xf32>
    %4 = vector.shape_cast %3 : vector<1x8x128xf32> to vector<8x128xf32>
    %cst_3 = arith.constant dense<0.000000e+00> : vector<8x128xf32>
    %5 = tpu.matmul %1, %0, %cst_3 {dimension_numbers = #tpu.dot_dimension_numbers<[1], [0], [0], [1], [0, 0, 1, 1], [], []>} : vector<8x128xf32>, vector<128x128xf32>, vector<8x128xf32> -> vector<8x128xf32>
    %6 = arith.addf %4, %5 : vector<8x128xf32>
    %7 = math.tanh %6 : vector<8x128xf32>
    %c1_i32 = arith.constant 1 : i32
    %8 = arith.index_cast %c1_i32 : i32 to index
    %c0_4 = arith.constant 0 : index
    %c0_5 = arith.constant 0 : index
    %9 = vector.load %arg0[%8, %c0_4, %c0_5] : memref<8x8x128xf32, #tpu.memory_space<vmem>>, vector<1x8x128xf32>
    %10 = vector.shape_cast %9 : vector<1x8x128xf32> to vector<8x128xf32>
    %cst_6 = arith.constant dense<0.000000e+00> : vector<8x128xf32>
    %11 = tpu.matmul %7, %0, %cst_6 {dimension_numbers = #tpu.dot_dimension_numbers<[1], [0], [0], [1], [0, 0, 1, 1], [], []>} : vector<8x128xf32>, vector<128x128xf32>, vector<8x128xf32> -> vector<8x128xf32>
    %12 = arith.addf %10, %11 : vector<8x128xf32>
    %13 = math.tanh %12 : vector<8x128xf32>
    %c2_i32 = arith.constant 2 : i32
    %14 = arith.index_cast %c2_i32 : i32 to index
    %c0_7 = arith.constant 0 : index
    %c0_8 = arith.constant 0 : index
    %15 = vector.load %arg0[%14, %c0_7, %c0_8] : memref<8x8x128xf32, #tpu.memory_space<vmem>>, vector<1x8x128xf32>
    %16 = vector.shape_cast %15 : vector<1x8x128xf32> to vector<8x128xf32>
    %cst_9 = arith.constant dense<0.000000e+00> : vector<8x128xf32>
    %17 = tpu.matmul %13, %0, %cst_9 {dimension_numbers = #tpu.dot_dimension_numbers<[1], [0], [0], [1], [0, 0, 1, 1], [], []>} : vector<8x128xf32>, vector<128x128xf32>, vector<8x128xf32> -> vector<8x128xf32>
    %18 = arith.addf %16, %17 : vector<8x128xf32>
    %19 = math.tanh %18 : vector<8x128xf32>
    %c3_i32 = arith.constant 3 : i32
    %20 = arith.index_cast %c3_i32 : i32 to index
    %c0_10 = arith.constant 0 : index
    %c0_11 = arith.constant 0 : index
    %21 = vector.load %arg0[%20, %c0_10, %c0_11] : memref<8x8x128xf32, #tpu.memory_space<vmem>>, vector<1x8x128xf32>
    %22 = vector.shape_cast %21 : vector<1x8x128xf32> to vector<8x128xf32>
    %cst_12 = arith.constant dense<0.000000e+00> : vector<8x128xf32>
    %23 = tpu.matmul %19, %0, %cst_12 {dimension_numbers = #tpu.dot_dimension_numbers<[1], [0], [0], [1], [0, 0, 1, 1], [], []>} : vector<8x128xf32>, vector<128x128xf32>, vector<8x128xf32> -> vector<8x128xf32>
    %24 = arith.addf %22, %23 : vector<8x128xf32>
    %25 = math.tanh %24 : vector<8x128xf32>
    %c4_i32 = arith.constant 4 : i32
    %26 = arith.index_cast %c4_i32 : i32 to index
    %c0_13 = arith.constant 0 : index
    %c0_14 = arith.constant 0 : index
    %27 = vector.load %arg0[%26, %c0_13, %c0_14] : memref<8x8x128xf32, #tpu.memory_space<vmem>>, vector<1x8x128xf32>
    %28 = vector.shape_cast %27 : vector<1x8x128xf32> to vector<8x128xf32>
    %cst_15 = arith.constant dense<0.000000e+00> : vector<8x128xf32>
    %29 = tpu.matmul %25, %0, %cst_15 {dimension_numbers = #tpu.dot_dimension_numbers<[1], [0], [0], [1], [0, 0, 1, 1], [], []>} : vector<8x128xf32>, vector<128x128xf32>, vector<8x128xf32> -> vector<8x128xf32>
    %30 = arith.addf %28, %29 : vector<8x128xf32>
    %31 = math.tanh %30 : vector<8x128xf32>
    %c5_i32 = arith.constant 5 : i32
    %32 = arith.index_cast %c5_i32 : i32 to index
    %c0_16 = arith.constant 0 : index
    %c0_17 = arith.constant 0 : index
    %33 = vector.load %arg0[%32, %c0_16, %c0_17] : memref<8x8x128xf32, #tpu.memory_space<vmem>>, vector<1x8x128xf32>
    %34 = vector.shape_cast %33 : vector<1x8x128xf32> to vector<8x128xf32>
    %cst_18 = arith.constant dense<0.000000e+00> : vector<8x128xf32>
    %35 = tpu.matmul %31, %0, %cst_18 {dimension_numbers = #tpu.dot_dimension_numbers<[1], [0], [0], [1], [0, 0, 1, 1], [], []>} : vector<8x128xf32>, vector<128x128xf32>, vector<8x128xf32> -> vector<8x128xf32>
    %36 = arith.addf %34, %35 : vector<8x128xf32>
    %37 = math.tanh %36 : vector<8x128xf32>
    %c6_i32 = arith.constant 6 : i32
    %38 = arith.index_cast %c6_i32 : i32 to index
    %c0_19 = arith.constant 0 : index
    %c0_20 = arith.constant 0 : index
    %39 = vector.load %arg0[%38, %c0_19, %c0_20] : memref<8x8x128xf32, #tpu.memory_space<vmem>>, vector<1x8x128xf32>
    %40 = vector.shape_cast %39 : vector<1x8x128xf32> to vector<8x128xf32>
    %cst_21 = arith.constant dense<0.000000e+00> : vector<8x128xf32>
    %41 = tpu.matmul %37, %0, %cst_21 {dimension_numbers = #tpu.dot_dimension_numbers<[1], [0], [0], [1], [0, 0, 1, 1], [], []>} : vector<8x128xf32>, vector<128x128xf32>, vector<8x128xf32> -> vector<8x128xf32>
    %42 = arith.addf %40, %41 : vector<8x128xf32>
    %43 = math.tanh %42 : vector<8x128xf32>
    %c7_i32 = arith.constant 7 : i32
    %44 = arith.index_cast %c7_i32 : i32 to index
    %c0_22 = arith.constant 0 : index
    %c0_23 = arith.constant 0 : index
    %45 = vector.load %arg0[%44, %c0_22, %c0_23] : memref<8x8x128xf32, #tpu.memory_space<vmem>>, vector<1x8x128xf32>
    %46 = vector.shape_cast %45 : vector<1x8x128xf32> to vector<8x128xf32>
    %cst_24 = arith.constant dense<0.000000e+00> : vector<8x128xf32>
    %47 = tpu.matmul %43, %0, %cst_24 {dimension_numbers = #tpu.dot_dimension_numbers<[1], [0], [0], [1], [0, 0, 1, 1], [], []>} : vector<8x128xf32>, vector<128x128xf32>, vector<8x128xf32> -> vector<8x128xf32>
    %48 = arith.addf %46, %47 : vector<8x128xf32>
    %49 = math.tanh %48 : vector<8x128xf32>
    %c8_i32 = arith.constant 8 : i32
    %c0_25 = arith.constant 0 : index
    %c0_26 = arith.constant 0 : index
    %50 = vector.load %arg2[%c0_25, %c0_26] : memref<128x128xf32, #tpu.memory_space<vmem>>, vector<128x128xf32>
    %cst_27 = arith.constant dense<0.000000e+00> : vector<8x128xf32>
    %51 = tpu.matmul %49, %50, %cst_27 {dimension_numbers = #tpu.dot_dimension_numbers<[1], [0], [0], [1], [0, 0, 1, 1], [], []>} : vector<8x128xf32>, vector<128x128xf32>, vector<8x128xf32> -> vector<8x128xf32>
    %c0_28 = arith.constant 0 : index
    %c0_29 = arith.constant 0 : index
    %52 = vector.load %arg3[%c0_28, %c0_29] : memref<1x128xf32, #tpu.memory_space<vmem>>, vector<1x128xf32>
    %53 = vector.broadcast %52 : vector<1x128xf32> to vector<8x128xf32>
    %54 = arith.addf %51, %53 : vector<8x128xf32>
    %c0_30 = arith.constant 0 : index
    %c0_31 = arith.constant 0 : index
    %55 = vector.load %arg4[%c0_30, %c0_31] : memref<8x128xf32, #tpu.memory_space<vmem>>, vector<8x128xf32>
    tpu.vector_store %arg4[%c0_30, %c0_31], %54 {strides = array<i32>} : memref<8x128xf32, #tpu.memory_space<vmem>>, vector<8x128xf32>,
    return
  }
}

</mosaic_0001>

<bundles_post_ra>
// kernel: _rnn_forward.1
= control target key start
LH: loop header
LB: loop body
LE: loop exit
PB: predicated region body
PF: predicated region fallthrough
CT: control target
= control target key end

     0   :  { %v1216_v0 = vmov 0.0   ;;  %vm1217_vm0 = vmmov 0   ;;  %s1692_s1 = inlined_call_operand.vmem [shape: f32[128,128], index: 1, kind: input, shape index: {}]   ;;  %s1693_s0 = inlined_call_operand.vmem [shape: f32[8,8,128], index: 0, kind: input, shape index: {}]   ;;  %s1694_s2 = inlined_call_operand.vmem [shape: f32[128,128], index: 2, kind: input, shape index: {}]   ;;  %s1695_s3 = inlined_call_operand.vmem [shape: f32[1,128], index: 3, kind: input, shape index: {}]   ;;  %s1696_s4 = inlined_call_operand.vmem [shape: f32[8,128], index: 4, kind: output, shape index: {}]  }
   0x1   :  { %883 = vmatprep.subr.mxu0 %v1216_v0  ;;  %v1247_v1 = vld [vmem:[%s1692_s1 + $0x78] sm:$0xff]  ;;  %v1252_v2 = vld [vmem:[%s1692_s1 + $0x70] sm:$0xff]  ;;  %915 = vmatprep.mubr.msk.f32.mxu0 %vm1217_vm0, %v1216_v0  ;;  %v1262_v3 = vld [vmem:[%s1692_s1 + $0x68] sm:$0xff] }
   0x2   :  { %884 = vmatpush3.msra.mxu0 %v1247_v1  ;;  %918 = vmatprep.subr.mxu1 %v1216_v0  ;;  %v1271_v4 = vld [vmem:[%s1692_s1 + $0x60] sm:$0xff]  ;;  %v1280_v5 = vld [vmem:[%s1692_s1 + $0x58] sm:$0xff]  ;;  %v1289_v6 = vld [vmem:[%s1692_s1 + $0x50] sm:$0xff] }
   0x3   :  { %885 = vmatprep.subr.mxu0 %v1216_v0  ;;  %919 = vmatpush3.msra.mxu1 %v1247_v1  ;;  %v1298_v7 = vld [vmem:[%s1692_s1 + $0x48] sm:$0xff]  ;;  %v1307_v8 = vld [vmem:[%s1692_s1 + $0x40] sm:$0xff]  ;;  %v1316_v9 = vld [vmem:[%s1692_s1 + $0x38] sm:$0xff] }
   0x4   :  { %886 = vmatpush3.msra.mxu0 %v1252_v2  ;;  %920 = vmatprep.subr.mxu1 %v1216_v0  ;;  %v1325_v10 = vld [vmem:[%s1692_s1 + $0x30] sm:$0xff]  ;;  %v1334_v11 = vld [vmem:[%s1692_s1 + $0x28] sm:$0xff]  ;;  %v1343_v12 = vld [vmem:[%s1692_s1 + $0x20] sm:$0xff] }
   0x5   :  { %887 = vmatprep.subr.mxu0 %v1216_v0  ;;  %921 = vmatpush3.msra.mxu1 %v1252_v2  ;;  %v1352_v13 = vld [vmem:[%s1692_s1 + $0x18] sm:$0xff]  ;;  %v1361_v14 = vld [vmem:[%s1692_s1 + $0x10] sm:$0xff]  ;;  %v1370_v15 = vld [vmem:[%s1692_s1 + $0x8] sm:$0xff] }
   0x6   :  { %888 = vmatpush3.msra.mxu0 %v1262_v3  ;;  %922 = vmatprep.subr.mxu1 %v1216_v0  ;;  %v1379_v16 = vld [vmem:[%s1692_s1] sm:$0xff]  ;;  %v722_v22 = vld [vmem:[%s1693_s0 + $0x8] sm:$0xff]  ;;  %v723_v27 = vld [vmem:[%s1693_s0 + $0x10] sm:$0xff] }
   0x7   :  { %889 = vmatprep.subr.mxu0 %v1216_v0  ;;  %923 = vmatpush3.msra.mxu1 %v1262_v3  ;;  %v33_v17 = vld [vmem:[%s1693_s0] sm:$0xff]  ;;  %v724_v32 = vld [vmem:[%s1693_s0 + $0x18] sm:$0xff]  ;;  %v726_v42 = vld [vmem:[%s1693_s0 + $0x28] sm:$0xff] }
   0x8   :  { %890 = vmatpush3.msra.mxu0 %v1271_v4  ;;  %924 = vmatprep.subr.mxu1 %v1216_v0  ;;  %v725_v37 = vld [vmem:[%s1693_s0 + $0x20] sm:$0xff]  ;;  %v639_v47 = vld [vmem:[%s1694_s2 + $0x78] sm:$0xff]  ;;  %v638_v48 = vld [vmem:[%s1694_s2 + $0x70] sm:$0xff] }
   0x9   :  { %891 = vmatprep.subr.mxu0 %v1216_v0  ;;  %925 = vmatpush3.msra.mxu1 %v1271_v4  ;;  %v637_v49 = vld [vmem:[%s1694_s2 + $0x68] sm:$0xff]  ;;  %v636_v50 = vld [vmem:[%s1694_s2 + $0x60] sm:$0xff]  ;;  %v635_v51 = vld [vmem:[%s1694_s2 + $0x58] sm:$0xff] }
   0xa   :  { %892 = vmatpush3.msra.mxu0 %v1280_v5  ;;  %926 = vmatprep.subr.mxu1 %v1216_v0  ;;  %v634_v52 = vld [vmem:[%s1694_s2 + $0x50] sm:$0xff]  ;;  %v633_v53 = vld [vmem:[%s1694_s2 + $0x48] sm:$0xff]  ;;  %v632_v59 = vld [vmem:[%s1694_s2 + $0x40] sm:$0xff] }
   0xb   :  { %893 = vmatprep.subr.mxu0 %v1216_v0  ;;  %927 = vmatpush3.msra.mxu1 %v1280_v5  ;;  %v727_v54 = vld [vmem:[%s1693_s0 + $0x30] sm:$0xff]  ;;  %v631_v60 = vld [vmem:[%s1694_s2 + $0x38] sm:$0xff]  ;;  %v629_v62 = vld [vmem:[%s1694_s2 + $0x28] sm:$0xff] }
   0xc   :  { %894 = vmatpush3.msra.mxu0 %v1289_v6  ;;  %928 = vmatprep.subr.mxu1 %v1216_v0  ;;  %v630_v61 = vld [vmem:[%s1694_s2 + $0x30] sm:$0xff]  ;;  %v628_v63 = vld [vmem:[%s1694_s2 + $0x20] sm:$0xff] }
   0xd   :  { %895 = vmatprep.subr.mxu0 %v1216_v0  ;;  %929 = vmatpush3.msra.mxu1 %v1289_v6 }
   0xe   :  { %896 = vmatpush3.msra.mxu0 %v1298_v7  ;;  %930 = vmatprep.subr.mxu1 %v1216_v0 }
   0xf   :  { %897 = vmatprep.subr.mxu0 %v1216_v0  ;;  %931 = vmatpush3.msra.mxu1 %v1298_v7 }
  0x10   :  { %898 = vmatpush3.msra.mxu0 %v1307_v8  ;;  %932 = vmatprep.subr.mxu1 %v1216_v0 }
  0x11   :  { %899 = vmatprep.subr.mxu0 %v1216_v0  ;;  %933 = vmatpush3.msra.mxu1 %v1307_v8 }
  0x12   :  { %900 = vmatpush3.msra.mxu0 %v1316_v9  ;;  %934 = vmatprep.subr.mxu1 %v1216_v0 }
  0x13   :  { %901 = vmatprep.subr.mxu0 %v1216_v0  ;;  %935 = vmatpush3.msra.mxu1 %v1316_v9 }
  0x14   :  { %902 = vmatpush3.msra.mxu0 %v1325_v10  ;;  %936 = vmatprep.subr.mxu1 %v1216_v0 }
  0x15   :  { %903 = vmatprep.subr.mxu0 %v1216_v0  ;;  %937 = vmatpush3.msra.mxu1 %v1325_v10 }
  0x16   :  { %904 = vmatpush3.msra.mxu0 %v1334_v11  ;;  %938 = vmatprep.subr.mxu1 %v1216_v0 }
  0x17   :  { %905 = vmatprep.subr.mxu0 %v1216_v0  ;;  %939 = vmatpush3.msra.mxu1 %v1334_v11 }
  0x18   :  { %906 = vmatpush3.msra.mxu0 %v1343_v12  ;;  %940 = vmatprep.subr.mxu1 %v1216_v0 }
  0x19   :  { %907 = vmatprep.subr.mxu0 %v1216_v0  ;;  %941 = vmatpush3.msra.mxu1 %v1343_v12 }
  0x1a   :  { %908 = vmatpush3.msra.mxu0 %v1352_v13  ;;  %942 = vmatprep.subr.mxu1 %v1216_v0 }
  0x1b   :  { %909 = vmatprep.subr.mxu0 %v1216_v0  ;;  %943 = vmatpush3.msra.mxu1 %v1352_v13 }
  0x1c   :  { %910 = vmatpush3.msra.mxu0 %v1361_v14  ;;  %944 = vmatprep.subr.mxu1 %v1216_v0 }
  0x1d   :  { %911 = vmatprep.subr.mxu0 %v1216_v0  ;;  %945 = vmatpush3.msra.mxu1 %v1361_v14 }
  0x1e   :  { %912 = vmatpush3.msra.mxu0 %v1370_v15  ;;  %946 = vmatprep.subr.mxu1 %v1216_v0 }
  0x1f   :  { %913 = vmatprep.subr.mxu0 %v1216_v0  ;;  %947 = vmatpush3.msra.mxu1 %v1370_v15 }
  0x20   :  { %914 = vmatpush3.msra.mxu0 %v1379_v16  ;;  %948 = vmatprep.subr.mxu1 %v1216_v0 }
  0x21   :  { %916 = vmatmul.mubr.f32.vlgmr.msra.gmra.mxu0 %v1216_v0  ;;  %949 = vmatpush3.msra.mxu1 %v1379_v16 }
  0x22   :  { %950 = vmatprep.mubr.msk.f32.mxu1 %vm1217_vm0, %v1216_v0  ;;  %953 = vmatprep.subr.mxu0 %v1216_v0 }
  0x23   :  { %954 = vmatpush3.msra.mxu0 %v1247_v1  ;;  %985 = vmatprep.mubr.msk.f32.mxu0 %vm1217_vm0, %v1216_v0 }
  0x24   :  { %955 = vmatprep.subr.mxu0 %v1216_v0  ;;  %988 = vmatprep.subr.mxu1 %v1216_v0 }
  0x25   :  { %956 = vmatpush3.msra.mxu0 %v1252_v2 }
  0x26   :  { %957 = vmatprep.subr.mxu0 %v1216_v0 }
  0x27   :  { %958 = vmatpush3.msra.mxu0 %v1262_v3 }
  0x28   :  { %959 = vmatprep.subr.mxu0 %v1216_v0 }
  0x29   :  { %960 = vmatpush3.msra.mxu0 %v1271_v4 }
  0x2a   :  { %961 = vmatprep.subr.mxu0 %v1216_v0 }
  0x2b   :  { %962 = vmatpush3.msra.mxu0 %v1280_v5 }
  0x2c   :  { %963 = vmatprep.subr.mxu0 %v1216_v0 }
  0x2d   :  { %964 = vmatpush3.msra.mxu0 %v1289_v6 }
  0x2e   :  { %965 = vmatprep.subr.mxu0 %v1216_v0 }
  0x2f   :  { %966 = vmatpush3.msra.mxu0 %v1298_v7 }
  0x30   :  { %967 = vmatprep.subr.mxu0 %v1216_v0 }
  0x31   :  { %968 = vmatpush3.msra.mxu0 %v1307_v8 }
  0x32   :  { %969 = vmatprep.subr.mxu0 %v1216_v0 }
  0x33   :  { %970 = vmatpush3.msra.mxu0 %v1316_v9 }
  0x34   :  { %971 = vmatprep.subr.mxu0 %v1216_v0 }
  0x35   :  { %972 = vmatpush3.msra.mxu0 %v1325_v10 }
  0x36   :  { %973 = vmatprep.subr.mxu0 %v1216_v0 }
  0x37   :  { %974 = vmatpush3.msra.mxu0 %v1334_v11 }
  0x38   :  { %975 = vmatprep.subr.mxu0 %v1216_v0 }
  0x39   :  { %976 = vmatpush3.msra.mxu0 %v1343_v12 }
  0x3a   :  { %977 = vmatprep.subr.mxu0 %v1216_v0 }
  0x3b   :  { %978 = vmatpush3.msra.mxu0 %v1352_v13 }
  0x3c   :  { %979 = vmatprep.subr.mxu0 %v1216_v0 }
  0x3d   :  { %980 = vmatpush3.msra.mxu0 %v1361_v14 }
  0x3e   :  { %981 = vmatprep.subr.mxu0 %v1216_v0 }
  0x3f   :  { %982 = vmatpush3.msra.mxu0 %v1370_v15 }
  0x40   :  { %983 = vmatprep.subr.mxu0 %v1216_v0 }
  0x41   :  { %984 = vmatpush3.msra.mxu0 %v1379_v16 }
  0x42   :  { %1023 = vmatprep.subr.mxu0 %v1216_v0 }
  0xe1   :  { %v100_v18 = vpop.f32.mrf.mxu0 }
  0xe2   :  { %v104_v19 = vadd.f32 %v100_v18, %v33_v17 }
  0xe3   :  { %v917_v20 = vpop.f32.mrf.mxu0 }
  0xe4   :  { %1200 = vtanh.f32 %v104_v19 }
  0xf1   :  { %v1201_v21 = vpop.eup %1200 }
  0xf2   :  { %951 = vmatmul.mubr.f32.vlgmr.msra.gmra.mxu1 %v1201_v21 }
  0xf3   :  { %989 = vmatpush3.msra.mxu1 %v1247_v1  ;;  %1020 = vmatprep.mubr.msk.f32.mxu1 %vm1217_vm0, %v1216_v0 }
  0xf4   :  { %990 = vmatprep.subr.mxu1 %v1216_v0 }
  0xf5   :  { %991 = vmatpush3.msra.mxu1 %v1252_v2 }
  0xf6   :  { %992 = vmatprep.subr.mxu1 %v1216_v0 }
  0xf7   :  { %993 = vmatpush3.msra.mxu1 %v1262_v3 }
  0xf8   :  { %994 = vmatprep.subr.mxu1 %v1216_v0 }
  0xf9   :  { %995 = vmatpush3.msra.mxu1 %v1271_v4 }
  0xfa   :  { %996 = vmatprep.subr.mxu1 %v1216_v0 }
  0xfb   :  { %997 = vmatpush3.msra.mxu1 %v1280_v5 }
  0xfc   :  { %998 = vmatprep.subr.mxu1 %v1216_v0 }
  0xfd   :  { %999 = vmatpush3.msra.mxu1 %v1289_v6 }
  0xfe   :  { %1000 = vmatprep.subr.mxu1 %v1216_v0 }
  0xff   :  { %1001 = vmatpush3.msra.mxu1 %v1298_v7 }
 0x100   :  { %1002 = vmatprep.subr.mxu1 %v1216_v0 }
 0x101   :  { %1003 = vmatpush3.msra.mxu1 %v1307_v8 }
 0x102   :  { %1004 = vmatprep.subr.mxu1 %v1216_v0 }
 0x103   :  { %1005 = vmatpush3.msra.mxu1 %v1316_v9 }
 0x104   :  { %1006 = vmatprep.subr.mxu1 %v1216_v0 }
 0x105   :  { %1007 = vmatpush3.msra.mxu1 %v1325_v10 }
 0x106   :  { %1008 = vmatprep.subr.mxu1 %v1216_v0 }
 0x107   :  { %1009 = vmatpush3.msra.mxu1 %v1334_v11 }
 0x108   :  { %1010 = vmatprep.subr.mxu1 %v1216_v0 }
 0x109   :  { %1011 = vmatpush3.msra.mxu1 %v1343_v12 }
 0x10a   :  { %1012 = vmatprep.subr.mxu1 %v1216_v0 }
 0x10b   :  { %1013 = vmatpush3.msra.mxu1 %v1352_v13 }
 0x10c   :  { %1014 = vmatprep.subr.mxu1 %v1216_v0 }
 0x10d   :  { %1015 = vmatpush3.msra.mxu1 %v1361_v14 }
 0x10e   :  { %1016 = vmatprep.subr.mxu1 %v1216_v0 }
 0x10f   :  { %1017 = vmatpush3.msra.mxu1 %v1370_v15 }
 0x110   :  { %1018 = vmatprep.subr.mxu1 %v1216_v0 }
 0x111   :  { %1019 = vmatpush3.msra.mxu1 %v1379_v16 }
 0x112   :  { %1058 = vmatprep.subr.mxu1 %v1216_v0 }
 0x1b2   :  { %v174_v23 = vpop.f32.mrf.mxu1 }
 0x1b3   :  { %v178_v24 = vadd.f32 %v722_v22, %v174_v23 }
 0x1b4   :  { %v952_v25 = vpop.f32.mrf.mxu1 }
 0x1b5   :  { %1202 = vtanh.f32 %v178_v24 }
 0x1c2   :  { %v1203_v26 = vpop.eup %1202 }
 0x1c3   :  { %986 = vmatmul.mubr.f32.vlgmr.msra.gmra.mxu0 %v1203_v26 }
 0x1c4   :  { %1024 = vmatpush3.msra.mxu0 %v1247_v1  ;;  %1055 = vmatprep.mubr.msk.f32.mxu0 %vm1217_vm0, %v1216_v0 }
 0x1c5   :  { %1025 = vmatprep.subr.mxu0 %v1216_v0 }
 0x1c6   :  { %1026 = vmatpush3.msra.mxu0 %v1252_v2 }
 0x1c7   :  { %1027 = vmatprep.subr.mxu0 %v1216_v0 }
 0x1c8   :  { %1028 = vmatpush3.msra.mxu0 %v1262_v3 }
 0x1c9   :  { %1029 = vmatprep.subr.mxu0 %v1216_v0 }
 0x1ca   :  { %1030 = vmatpush3.msra.mxu0 %v1271_v4 }
 0x1cb   :  { %1031 = vmatprep.subr.mxu0 %v1216_v0 }
 0x1cc   :  { %1032 = vmatpush3.msra.mxu0 %v1280_v5 }
 0x1cd   :  { %1033 = vmatprep.subr.mxu0 %v1216_v0 }
 0x1ce   :  { %1034 = vmatpush3.msra.mxu0 %v1289_v6 }
 0x1cf   :  { %1035 = vmatprep.subr.mxu0 %v1216_v0 }
 0x1d0   :  { %1036 = vmatpush3.msra.mxu0 %v1298_v7 }
 0x1d1   :  { %1037 = vmatprep.subr.mxu0 %v1216_v0 }
 0x1d2   :  { %1038 = vmatpush3.msra.mxu0 %v1307_v8 }
 0x1d3   :  { %1039 = vmatprep.subr.mxu0 %v1216_v0 }
 0x1d4   :  { %1040 = vmatpush3.msra.mxu0 %v1316_v9 }
 0x1d5   :  { %1041 = vmatprep.subr.mxu0 %v1216_v0 }
 0x1d6   :  { %1042 = vmatpush3.msra.mxu0 %v1325_v10 }
 0x1d7   :  { %1043 = vmatprep.subr.mxu0 %v1216_v0 }
 0x1d8   :  { %1044 = vmatpush3.msra.mxu0 %v1334_v11 }
 0x1d9   :  { %1045 = vmatprep.subr.mxu0 %v1216_v0 }
 0x1da   :  { %1046 = vmatpush3.msra.mxu0 %v1343_v12 }
 0x1db   :  { %1047 = vmatprep.subr.mxu0 %v1216_v0 }
 0x1dc   :  { %1048 = vmatpush3.msra.mxu0 %v1352_v13 }
 0x1dd   :  { %1049 = vmatprep.subr.mxu0 %v1216_v0 }
 0x1de   :  { %1050 = vmatpush3.msra.mxu0 %v1361_v14 }
 0x1df   :  { %1051 = vmatprep.subr.mxu0 %v1216_v0 }
 0x1e0   :  { %1052 = vmatpush3.msra.mxu0 %v1370_v15 }
 0x1e1   :  { %1053 = vmatprep.subr.mxu0 %v1216_v0 }
 0x1e2   :  { %1054 = vmatpush3.msra.mxu0 %v1379_v16 }
 0x1e3   :  { %1093 = vmatprep.subr.mxu0 %v1216_v0 }
 0x283   :  { %v248_v28 = vpop.f32.mrf.mxu0 }
 0x284   :  { %v252_v29 = vadd.f32 %v723_v27, %v248_v28 }
 0x285   :  { %v987_v30 = vpop.f32.mrf.mxu0 }
 0x286   :  { %1204 = vtanh.f32 %v252_v29 }
 0x293   :  { %v1205_v31 = vpop.eup %1204 }
 0x294   :  { %1021 = vmatmul.mubr.f32.vlgmr.msra.gmra.mxu1 %v1205_v31 }
 0x295   :  { %1059 = vmatpush3.msra.mxu1 %v1247_v1  ;;  %1090 = vmatprep.mubr.msk.f32.mxu1 %vm1217_vm0, %v1216_v0 }
 0x296   :  { %1060 = vmatprep.subr.mxu1 %v1216_v0 }
 0x297   :  { %1061 = vmatpush3.msra.mxu1 %v1252_v2 }
 0x298   :  { %1062 = vmatprep.subr.mxu1 %v1216_v0 }
 0x299   :  { %1063 = vmatpush3.msra.mxu1 %v1262_v3 }
 0x29a   :  { %1064 = vmatprep.subr.mxu1 %v1216_v0 }
 0x29b   :  { %1065 = vmatpush3.msra.mxu1 %v1271_v4 }
 0x29c   :  { %1066 = vmatprep.subr.mxu1 %v1216_v0 }
 0x29d   :  { %1067 = vmatpush3.msra.mxu1 %v1280_v5 }
 0x29e   :  { %1068 = vmatprep.subr.mxu1 %v1216_v0 }
 0x29f   :  { %1069 = vmatpush3.msra.mxu1 %v1289_v6 }
 0x2a0   :  { %1070 = vmatprep.subr.mxu1 %v1216_v0 }
 0x2a1   :  { %1071 = vmatpush3.msra.mxu1 %v1298_v7 }
 0x2a2   :  { %1072 = vmatprep.subr.mxu1 %v1216_v0 }
 0x2a3   :  { %1073 = vmatpush3.msra.mxu1 %v1307_v8 }
 0x2a4   :  { %1074 = vmatprep.subr.mxu1 %v1216_v0 }
 0x2a5   :  { %1075 = vmatpush3.msra.mxu1 %v1316_v9 }
 0x2a6   :  { %1076 = vmatprep.subr.mxu1 %v1216_v0 }
 0x2a7   :  { %1077 = vmatpush3.msra.mxu1 %v1325_v10 }
 0x2a8   :  { %1078 = vmatprep.subr.mxu1 %v1216_v0 }
 0x2a9   :  { %1079 = vmatpush3.msra.mxu1 %v1334_v11 }
 0x2aa   :  { %1080 = vmatprep.subr.mxu1 %v1216_v0 }
 0x2ab   :  { %1081 = vmatpush3.msra.mxu1 %v1343_v12 }
 0x2ac   :  { %1082 = vmatprep.subr.mxu1 %v1216_v0 }
 0x2ad   :  { %1083 = vmatpush3.msra.mxu1 %v1352_v13 }
 0x2ae   :  { %1084 = vmatprep.subr.mxu1 %v1216_v0 }
 0x2af   :  { %1085 = vmatpush3.msra.mxu1 %v1361_v14 }
 0x2b0   :  { %1086 = vmatprep.subr.mxu1 %v1216_v0 }
 0x2b1   :  { %1087 = vmatpush3.msra.mxu1 %v1370_v15 }
 0x2b2   :  { %1088 = vmatprep.subr.mxu1 %v1216_v0 }
 0x2b3   :  { %1089 = vmatpush3.msra.mxu1 %v1379_v16 }
 0x2b4   :  { %1128 = vmatprep.subr.mxu1 %v1216_v0 }
 0x354   :  { %v322_v33 = vpop.f32.mrf.mxu1 }
 0x355   :  { %v326_v34 = vadd.f32 %v724_v32, %v322_v33 }
 0x356   :  { %v1022_v35 = vpop.f32.mrf.mxu1 }
 0x357   :  { %1206 = vtanh.f32 %v326_v34 }
 0x364   :  { %v1207_v36 = vpop.eup %1206 }
 0x365   :  { %1056 = vmatmul.mubr.f32.vlgmr.msra.gmra.mxu0 %v1207_v36 }
 0x366   :  { %1094 = vmatpush3.msra.mxu0 %v1247_v1  ;;  %1125 = vmatprep.mubr.msk.f32.mxu0 %vm1217_vm0, %v1216_v0 }
 0x367   :  { %1095 = vmatprep.subr.mxu0 %v1216_v0 }
 0x368   :  { %1096 = vmatpush3.msra.mxu0 %v1252_v2 }
 0x369   :  { %1097 = vmatprep.subr.mxu0 %v1216_v0 }
 0x36a   :  { %1098 = vmatpush3.msra.mxu0 %v1262_v3 }
 0x36b   :  { %1099 = vmatprep.subr.mxu0 %v1216_v0 }
 0x36c   :  { %1100 = vmatpush3.msra.mxu0 %v1271_v4 }
 0x36d   :  { %1101 = vmatprep.subr.mxu0 %v1216_v0 }
 0x36e   :  { %1102 = vmatpush3.msra.mxu0 %v1280_v5 }
 0x36f   :  { %1103 = vmatprep.subr.mxu0 %v1216_v0 }
 0x370   :  { %1104 = vmatpush3.msra.mxu0 %v1289_v6 }
 0x371   :  { %1105 = vmatprep.subr.mxu0 %v1216_v0 }
 0x372   :  { %1106 = vmatpush3.msra.mxu0 %v1298_v7 }
 0x373   :  { %1107 = vmatprep.subr.mxu0 %v1216_v0 }
 0x374   :  { %1108 = vmatpush3.msra.mxu0 %v1307_v8 }
 0x375   :  { %1109 = vmatprep.subr.mxu0 %v1216_v0 }
 0x376   :  { %1110 = vmatpush3.msra.mxu0 %v1316_v9 }
 0x377   :  { %1111 = vmatprep.subr.mxu0 %v1216_v0 }
 0x378   :  { %1112 = vmatpush3.msra.mxu0 %v1325_v10 }
 0x379   :  { %1113 = vmatprep.subr.mxu0 %v1216_v0 }
 0x37a   :  { %1114 = vmatpush3.msra.mxu0 %v1334_v11 }
 0x37b   :  { %1115 = vmatprep.subr.mxu0 %v1216_v0 }
 0x37c   :  { %1116 = vmatpush3.msra.mxu0 %v1343_v12 }
 0x37d   :  { %1117 = vmatprep.subr.mxu0 %v1216_v0 }
 0x37e   :  { %1118 = vmatpush3.msra.mxu0 %v1352_v13 }
 0x37f   :  { %1119 = vmatprep.subr.mxu0 %v1216_v0 }
 0x380   :  { %1120 = vmatpush3.msra.mxu0 %v1361_v14 }
 0x381   :  { %1121 = vmatprep.subr.mxu0 %v1216_v0 }
 0x382   :  { %1122 = vmatpush3.msra.mxu0 %v1370_v15 }
 0x383   :  { %1123 = vmatprep.subr.mxu0 %v1216_v0 }
 0x384   :  { %1124 = vmatpush3.msra.mxu0 %v1379_v16 }
 0x385   :  { %1163 = vmatprep.subr.mxu0 %v1216_v0 }
 0x425   :  { %v396_v38 = vpop.f32.mrf.mxu0 }
 0x426   :  { %v400_v39 = vadd.f32 %v725_v37, %v396_v38 }
 0x427   :  { %v1057_v40 = vpop.f32.mrf.mxu0 }
 0x428   :  { %1208 = vtanh.f32 %v400_v39 }
 0x435   :  { %v1209_v41 = vpop.eup %1208 }
 0x436   :  { %1091 = vmatmul.mubr.f32.vlgmr.msra.gmra.mxu1 %v1209_v41 }
 0x437   :  { %1129 = vmatpush3.msra.mxu1 %v1247_v1  ;;  %1160 = vmatprep.mubr.msk.f32.mxu1 %vm1217_vm0, %v1216_v0  ;;  %v627_v1 = vld [vmem:[%s1694_s2 + $0x18] sm:$0xff] }
 0x438   :  { %1130 = vmatprep.subr.mxu1 %v1216_v0 }
 0x439   :  { %1131 = vmatpush3.msra.mxu1 %v1252_v2  ;;  %v626_v2 = vld [vmem:[%s1694_s2 + $0x10] sm:$0xff] }
 0x43a   :  { %1132 = vmatprep.subr.mxu1 %v1216_v0 }
 0x43b   :  { %1133 = vmatpush3.msra.mxu1 %v1262_v3  ;;  %v625_v3 = vld [vmem:[%s1694_s2 + $0x8] sm:$0xff] }
 0x43c   :  { %1134 = vmatprep.subr.mxu1 %v1216_v0 }
 0x43d   :  { %1135 = vmatpush3.msra.mxu1 %v1271_v4  ;;  %v624_v4 = vld [vmem:[%s1694_s2] sm:$0xff] }
 0x43e   :  { %1136 = vmatprep.subr.mxu1 %v1216_v0 }
 0x43f   :  { %1137 = vmatpush3.msra.mxu1 %v1280_v5  ;;  %v728_v5 = vld [vmem:[%s1693_s0 + $0x38] sm:$0xff] }
 0x440   :  { %1138 = vmatprep.subr.mxu1 %v1216_v0 }
 0x441   :  { %1139 = vmatpush3.msra.mxu1 %v1289_v6 }
 0x442   :  { %1140 = vmatprep.subr.mxu1 %v1216_v0 }
 0x443   :  { %1141 = vmatpush3.msra.mxu1 %v1298_v7 }
 0x444   :  { %1142 = vmatprep.subr.mxu1 %v1216_v0 }
 0x445   :  { %1143 = vmatpush3.msra.mxu1 %v1307_v8 }
 0x446   :  { %1144 = vmatprep.subr.mxu1 %v1216_v0 }
 0x447   :  { %1145 = vmatpush3.msra.mxu1 %v1316_v9 }
 0x448   :  { %1146 = vmatprep.subr.mxu1 %v1216_v0 }
 0x449   :  { %1147 = vmatpush3.msra.mxu1 %v1325_v10  ;;  %v729_v10 = vld [vmem:[%s1695_s3] ss:$0 sm:$0xff] }
 0x44a   :  { %1148 = vmatprep.subr.mxu1 %v1216_v0 }
 0x44b   :  { %1149 = vmatpush3.msra.mxu1 %v1334_v11 }
 0x44c   :  { %1150 = vmatprep.subr.mxu1 %v1216_v0 }
 0x44d   :  { %1151 = vmatpush3.msra.mxu1 %v1343_v12 }
 0x44e   :  { %1152 = vmatprep.subr.mxu1 %v1216_v0 }
 0x44f   :  { %1153 = vmatpush3.msra.mxu1 %v1352_v13 }
 0x450   :  { %1154 = vmatprep.subr.mxu1 %v1216_v0 }
 0x451   :  { %1155 = vmatpush3.msra.mxu1 %v1361_v14 }
 0x452   :  { %1156 = vmatprep.subr.mxu1 %v1216_v0 }
 0x453   :  { %1157 = vmatpush3.msra.mxu1 %v1370_v15 }
 0x454   :  { %1158 = vmatprep.subr.mxu1 %v1216_v0 }
 0x455   :  { %1159 = vmatpush3.msra.mxu1 %v1379_v16 }
 0x4f6   :  { %v470_v43 = vpop.f32.mrf.mxu1 }
 0x4f7   :  { %v474_v44 = vadd.f32 %v726_v42, %v470_v43 }
 0x4f8   :  { %v1092_v45 = vpop.f32.mrf.mxu1 }
 0x4f9   :  { %1210 = vtanh.f32 %v474_v44 }
 0x506   :  { %v1211_v46 = vpop.eup %1210 }
 0x507   :  { %1126 = vmatmul.mubr.f32.vlgmr.msra.gmra.mxu0 %v1211_v46 }
 0x508   :  { %1195 = vmatprep.mubr.msk.f32.mxu0 %vm1217_vm0, %v1216_v0  ;;  %1164 = vmatpush3.msra.mxu0 %v639_v47 }
 0x509   :  { %1165 = vmatprep.subr.mxu0 %v1216_v0 }
 0x50a   :  { %1166 = vmatpush3.msra.mxu0 %v638_v48 }
 0x50b   :  { %1167 = vmatprep.subr.mxu0 %v1216_v0 }
 0x50c   :  { %1168 = vmatpush3.msra.mxu0 %v637_v49 }
 0x50d   :  { %1169 = vmatprep.subr.mxu0 %v1216_v0 }
 0x50e   :  { %1170 = vmatpush3.msra.mxu0 %v636_v50 }
 0x50f   :  { %1171 = vmatprep.subr.mxu0 %v1216_v0 }
 0x510   :  { %1172 = vmatpush3.msra.mxu0 %v635_v51 }
 0x511   :  { %1173 = vmatprep.subr.mxu0 %v1216_v0 }
 0x512   :  { %1174 = vmatpush3.msra.mxu0 %v634_v52 }
 0x513   :  { %1175 = vmatprep.subr.mxu0 %v1216_v0 }
 0x514   :  { %1176 = vmatpush3.msra.mxu0 %v633_v53 }
 0x515   :  { %1177 = vmatprep.subr.mxu0 %v1216_v0 }
 0x516   :  { %1178 = vmatpush3.msra.mxu0 %v632_v59 }
 0x517   :  { %1179 = vmatprep.subr.mxu0 %v1216_v0 }
 0x518   :  { %1180 = vmatpush3.msra.mxu0 %v631_v60 }
 0x519   :  { %1181 = vmatprep.subr.mxu0 %v1216_v0 }
 0x51a   :  { %1182 = vmatpush3.msra.mxu0 %v630_v61 }
 0x51b   :  { %1183 = vmatprep.subr.mxu0 %v1216_v0 }
 0x51c   :  { %1184 = vmatpush3.msra.mxu0 %v629_v62 }
 0x51d   :  { %1185 = vmatprep.subr.mxu0 %v1216_v0 }
 0x51e   :  { %1186 = vmatpush3.msra.mxu0 %v628_v63 }
 0x51f   :  { %1187 = vmatprep.subr.mxu0 %v1216_v0 }
 0x520   :  { %1188 = vmatpush3.msra.mxu0 %v627_v1 }
 0x521   :  { %1189 = vmatprep.subr.mxu0 %v1216_v0 }
 0x522   :  { %1190 = vmatpush3.msra.mxu0 %v626_v2 }
 0x523   :  { %1191 = vmatprep.subr.mxu0 %v1216_v0 }
 0x524   :  { %1192 = vmatpush3.msra.mxu0 %v625_v3 }
 0x525   :  { %1193 = vmatprep.subr.mxu0 %v1216_v0 }
 0x526   :  { %1194 = vmatpush3.msra.mxu0 %v624_v4 }
 0x5c7   :  { %v544_v55 = vpop.f32.mrf.mxu0 }
 0x5c8   :  { %v548_v56 = vadd.f32 %v727_v54, %v544_v55 }
 0x5c9   :  { %v1127_v57 = vpop.f32.mrf.mxu0 }
 0x5ca   :  { %1212 = vtanh.f32 %v548_v56 }
 0x5d7   :  { %v1213_v58 = vpop.eup %1212 }
 0x5d8   :  { %1161 = vmatmul.mubr.f32.vlgmr.msra.gmra.mxu1 %v1213_v58 }
 0x698   :  { %v618_v6 = vpop.f32.mrf.mxu1 }
 0x699   :  { %v622_v7 = vadd.f32 %v728_v5, %v618_v6 }
 0x69a   :  { %v1162_v8 = vpop.f32.mrf.mxu1 }
 0x69b   :  { %1214 = vtanh.f32 %v622_v7 }
 0x6a8   :  { %v1215_v9 = vpop.eup %1214 }
 0x6a9   :  { %1196 = vmatmul.mubr.f32.vlgmr.msra.gmra.mxu0 %v1215_v9 }
 0x769   :  { %v713_v11 = vpop.f32.mrf.mxu0 }
 0x76a   :  { %v714_v12 = vadd.f32 %v729_v10, %v713_v11 }
 0x76b   :  { %v1197_v13 = vpop.f32.mrf.mxu0 }
 0x76c   :  { %717 = vst [vmem:[%s1696_s4] sm:$0xff] %v714_v12 }

</bundles_post_ra>
